<compile_context>
chip_gen: v6e
topology: v6e:2x2x1
jax: 0.10.0
libtpu: 0.0.40
codegen_flags: <defaults>
</compile_context>

<pallas_src>
import jax
import jax.numpy as jnp
from jax.experimental import pallas as pl
from jax.experimental.pallas import tpu as pltpu

IMAGENET_MEAN = (0.485, 0.456, 0.406)
IMAGENET_STD = (0.229, 0.224, 0.225)

_ROW_TILE_TARGET = 256    # multiple of 8
_LANE_TILE_TARGET = 2048  # multiple of 128; ~86% of HBM roofline per measurements


def _normalize_kernel(x_ref, scale_ref, shift_ref, o_ref):
    # x_ref:     (row_tile, col_tile)  current tile of the (N*C, H*W) slab
    # scale_ref: (row_tile, 1)         per-row 1/std
    # shift_ref: (row_tile, 1)         per-row -mean/std
    x = x_ref[...].astype(jnp.float32)                 # x.float()
    o_ref[...] = x * scale_ref[...] + shift_ref[...]   # (x - mean) / std


def normalize(x, mean, std, out_dtype=jnp.float32):
    """x: (N, C, H, W) any float dtype; mean/std: (C,) float32.

    Returns (N, C, H, W) in `out_dtype` (default float32, matching PyTorch's
    x.float()) with (x - mean) / std applied per channel.
    """
    N, C, H, W = x.shape
    rows = N * C
    HW = H * W

    # Flatten to a lane-dense 2-D slab; pre-combine the stats into per-row
    # scale/shift so the kernel body is one multiply-add on the VPU.
    x2d = x.reshape(rows, HW)
    inv_std = 1.0 / std.astype(jnp.float32)
    scale_rows = jnp.tile(inv_std, N).reshape(rows, 1)
    shift_rows = jnp.tile(-mean.astype(jnp.float32) * inv_std, N).reshape(rows, 1)

    # Row tile: full extent if small (legal even when rows % 8 != 0),
    # otherwise a multiple-of-8 tile with a ragged last block.
    row_tile = rows if rows <= _ROW_TILE_TARGET else _ROW_TILE_TARGET
    # Lane tile: full extent if small (legal even when HW % 128 != 0),
    # otherwise a multiple-of-128 tile with a ragged last block.
    col_tile = HW if HW <= _LANE_TILE_TARGET else _LANE_TILE_TARGET

    grid = (pl.cdiv(rows, row_tile), pl.cdiv(HW, col_tile))

    out2d = pl.pallas_call(
        _normalize_kernel,
        out_shape=jax.ShapeDtypeStruct((rows, HW), out_dtype),
        grid_spec=pltpu.PrefetchScalarGridSpec(
            num_scalar_prefetch=0,
            grid=grid,
            in_specs=[
                pl.BlockSpec((row_tile, col_tile), lambda i, j: (i, j)),
                pl.BlockSpec((row_tile, 1), lambda i, j: (i, 0)),
                pl.BlockSpec((row_tile, 1), lambda i, j: (i, 0)),
            ],
            out_specs=pl.BlockSpec((row_tile, col_tile), lambda i, j: (i, j)),
        ),
        compiler_params=pltpu.CompilerParams(
            dimension_semantics=("parallel", "parallel")
        ),
    )(x2d, scale_rows, shift_rows)

    return out2d.reshape(N, C, H, W)


def normalize_module_forward(x):
    """Full forward of the PyTorch `Normalize` module."""
    mean = jnp.asarray(IMAGENET_MEAN, dtype=jnp.float32)
    std = jnp.asarray(IMAGENET_STD, dtype=jnp.float32)
    y = normalize(x, mean, std)
    # TODO(synk): self.module is an arbitrary wrapped network; identity used here.
    return y


def _reference(x):
    mean = jnp.asarray(IMAGENET_MEAN, dtype=jnp.float32).reshape(1, 3, 1, 1)
    std = jnp.asarray(IMAGENET_STD, dtype=jnp.float32).reshape(1, 3, 1, 1)
    return (x.astype(jnp.float32) - mean) / std


if __name__ == "__main__":
    key = jax.random.PRNGKey(0)

    # Small NCHW input consistent with ImageNet-style 3-channel stats.
    x = jax.random.uniform(key, (2, 3, 16, 16), dtype=jnp.float32)
    out = jax.block_until_ready(normalize_module_forward(x))
    ref = _reference(x)
    assert out.shape == ref.shape and out.dtype == jnp.float32
    assert jnp.max(jnp.abs(out - ref)) < 1e-5

    # Second small shape exercising the ragged lane-tile path (HW > lane tile,
    # HW not a multiple of the lane tile).
    x2 = jax.random.uniform(jax.random.PRNGKey(0), (4, 3, 56, 96), dtype=jnp.float32)
    out2 = jax.block_until_ready(normalize_module_forward(x2))
    ref2 = _reference(x2)
    assert out2.shape == ref2.shape and out2.dtype == jnp.float32
    assert jnp.max(jnp.abs(out2 - ref2)) < 1e-5

    print("KERNEL_OK")
</pallas_src>

<mosaic_0001>
module attributes {stable_mosaic.version = 11 : i64} {
  func.func @_normalize_kernel(%arg0: i32, %arg1: i32, %arg2: memref<6x256xf32, #tpu.memory_space<vmem>>, %arg3: memref<6x1xf32, #tpu.memory_space<vmem>>, %arg4: memref<6x1xf32, #tpu.memory_space<vmem>>, %arg5: memref<6x256xf32, #tpu.memory_space<vmem>>) attributes {dimension_semantics = [#tpu.dimension_semantics<parallel>, #tpu.dimension_semantics<parallel>], iteration_bounds = array<i64: 1, 1>, scalar_prefetch = 0 : i64, scratch_operands = 0 : i64, tpu.core_type = #tpu.core_type<tc>, window_params = [{transform_indices = @transform_0, window_bounds = array<i64: 6, 256>}, {transform_indices = @transform_1, window_bounds = array<i64: 6, 1>}, {transform_indices = @transform_2, window_bounds = array<i64: 6, 1>}, {transform_indices = @transform_3, window_bounds = array<i64: 6, 256>}]} {
    %c0 = arith.constant 0 : index
    %c0_0 = arith.constant 0 : index
    %0 = vector.load %arg2[%c0, %c0_0] : memref<6x256xf32, #tpu.memory_space<vmem>>, vector<6x256xf32>
    %c0_1 = arith.constant 0 : index
    %c0_2 = arith.constant 0 : index
    %1 = vector.load %arg3[%c0_1, %c0_2] : memref<6x1xf32, #tpu.memory_space<vmem>>, vector<6x1xf32>
    %2 = vector.broadcast %1 : vector<6x1xf32> to vector<6x256xf32>
    %3 = arith.mulf %0, %2 : vector<6x256xf32>
    %c0_3 = arith.constant 0 : index
    %c0_4 = arith.constant 0 : index
    %4 = vector.load %arg4[%c0_3, %c0_4] : memref<6x1xf32, #tpu.memory_space<vmem>>, vector<6x1xf32>
    %5 = vector.broadcast %4 : vector<6x1xf32> to vector<6x256xf32>
    %6 = arith.addf %3, %5 : vector<6x256xf32>
    %c0_5 = arith.constant 0 : index
    %c0_6 = arith.constant 0 : index
    %7 = vector.load %arg5[%c0_5, %c0_6] : memref<6x256xf32, #tpu.memory_space<vmem>>, vector<6x256xf32>
    tpu.vector_store %arg5[%c0_5, %c0_6], %6 {strides = array<i32>} : memref<6x256xf32, #tpu.memory_space<vmem>>, vector<6x256xf32>,
    return
  }
  func.func @transform_0(%arg0: i32, %arg1: i32) -> (i32, i32) {
    %c0_i32 = arith.constant 0 : i32
    return %arg0, %arg1 : i32, i32
  }
  func.func @transform_1(%arg0: i32, %arg1: i32) -> (i32, i32) {
    %c0_i32 = arith.constant 0 : i32
    %c0_i32_0 = arith.constant 0 : i32
    return %arg0, %c0_i32 : i32, i32
  }
  func.func @transform_2(%arg0: i32, %arg1: i32) -> (i32, i32) {
    %c0_i32 = arith.constant 0 : i32
    %c0_i32_0 = arith.constant 0 : i32
    return %arg0, %c0_i32 : i32, i32
  }
  func.func @transform_3(%arg0: i32, %arg1: i32) -> (i32, i32) {
    %c0_i32 = arith.constant 0 : i32
    return %arg0, %arg1 : i32, i32
  }
}

</mosaic_0001>

<bundles_post_ra>
// kernel: tpu_custom_call.1
= control target key start
LH: loop header
LB: loop body
LE: loop exit
PB: predicated region body
PF: predicated region fallthrough
CT: control target
= control target key end

     0   :  { %v74_v1 = vmov 0   ;;  %s111_s0 = inlined_call_operand.vmem [shape: f32[6,256], index: 0, kind: input, shape index: {}]   ;;  %s112_s1 = inlined_call_operand.vmem [shape: f32[6,1], index: 1, kind: input, shape index: {}]   ;;  %s113_s2 = inlined_call_operand.vmem [shape: f32[6,1], index: 2, kind: input, shape index: {}]   ;;  %s114_s3 = inlined_call_operand.hbm [shape: f32[6,256], index: 3, kind: output, shape index: {}]  }
   0x1   :  { %v17_v0 = vld [vmem:[%s112_s1] sm:$0x3f]  ;;  %51 = vset.pattern.permute.xlu0 %v74_v1 }
   0x2   :  { %8 = vsyncpa [#allocation3], 0  ;;  %20 = vperm.xlu0 %51, %v17_v0   ;;  %v25_v2 = vld [vmem:[%s113_s2] sm:$0x3f]  ;;  %v16_v5 = vld [vmem:[%s111_s0 + $0x8] sm:$0x3f] }
   0x3   :  { %v15_v4 = vld [vmem:[%s111_s0] sm:$0x3f]  ;;  %s75_s20 = smov [#allocation2]  }
   0x4   :  { %s41_s1 = sshll.u32 %s75_s20, 4  ;;  %s42_s1 = int_to_ptr.vmem [resolvable:$true] %s41_s1 }
   0x5   :  { %s52_s2 = scalar_lea.vmem %s42_s1, 256  ;;  %p57_p1 = scmp.lt.s32.totalorder %s42_s1, %s42_s1 }
   0x6   :  { %28 = vperm.xlu0 %51, %v25_v2   ;;  %p53_p0 = scmp.ne.s32.totalorder %s42_s1, %s52_s2  ;;  %p58_p2 = scmp.lt.s32.totalorder %s52_s2, %s52_s2 }
   0x8   :  { %p59_p3 = por %p58_p2, %p57_p1 }
   0xa   :  { %p60_p4 = pnand %p59_p3, %p53_p0 }
  0x7d   :  { %v21_v3 = vpop.permute.xlu0 %20 }
  0x7e   :  { %v23_v6 = vmul.f32 %v21_v3, %v15_v4  ;;  %v24_v7 = vmul.f32 %v21_v3, %v16_v5 }
  0x81   :  { %v29_v8 = vpop.permute.xlu0 %28 }
  0x82   :  { %v31_v9 = vadd.f32 %v29_v8, %v23_v6  ;;  %v32_v10 = vadd.f32 %v29_v8, %v24_v7 }
  0x84   :  { %33 = vst [vmem:[#allocation2] sm:$0x3f] %v31_v9  ;;  %34 = vst [vmem:[#allocation2 + $0x8] sm:$0x3f] %v32_v10 }
  0x85   :  { %63 = shalt.err (!%p60_p4)
}
  0x86   :  { %44 = dma.vmem_to_hbm [thread:$0]  %s42_s1, 256, %s114_s3, [#allocation3]  }
  0x87   :  { %72 = dma.done.wait [#allocation3], 256  }
  0x88   :  { %73 = vsyncadd [#allocation3], 4294967040 }
  0x89   :  { %48 = vsyncpa [#allocation3], 1 }

</bundles_post_ra>
